<compile_context>
chip_gen: v7x
topology: tpu7x:2x2x1
jax: 0.10.0
libtpu: 0.0.40
codegen_flags: <defaults>
</compile_context>

<pallas_src>
import functools

import jax
import jax.numpy as jnp
import numpy as np
from jax import lax
from jax.experimental import pallas as pl
from jax.experimental.pallas import tpu as pltpu


def _mha_kernel(x_ref, wqkv_ref, wph_ref, b_ref, o_ref, *,
                batch, seq_len, num_heads):
    """Single invocation: fused QKV + head-batched causal attention + proj.

    Shapes inside the kernel:
      x_ref    : (B*T, C)   all batch rows, row order (b, t)
      wqkv_ref : (C, 3*C)   columns = [q heads | k heads | v heads], head-major;
                            the attention scale is pre-folded into the Q columns
      wph_ref  : (H, Dh, C) output-projection weight, rows grouped per head (in, out)
      b_ref    : (1, C)     projection bias
      o_ref    : (B*T, C)
    """
    B, T, H = batch, seq_len, num_heads
    BT, C = x_ref.shape
    Dh = C // H
    G = H * B                                   # head-batch group count

    x = x_ref[...]                              # (BT, C)

    # One MXU matmul for all of q/k/v, all heads, all batch rows.
    qkv = jnp.dot(x, wqkv_ref[...], preferred_element_type=jnp.float32)  # (BT, 3C)

    # Gather per-head lane slices into a (G, T, Dh) head-batch (g = h*B + b) so
    # the score / softmax / PV work runs as single batched ops, not H tiny ones.
    def group(col0):
        parts = [qkv[:, col0 + h * Dh: col0 + (h + 1) * Dh] for h in range(H)]
        return jnp.concatenate(parts, axis=0).reshape(G, T, Dh)

    q_g = group(0)            # scale already folded into the Q weight columns
    k_g = group(C)
    v_g = group(2 * C)

    # Batched scores + causal mask + softmax over all (h, b) at once.
    s = jnp.einsum('gtd,gsd->gts', q_g, k_g,
                   preferred_element_type=jnp.float32)            # (G, T, T)
    row = lax.broadcasted_iota(jnp.int32, (G, T, T), 1)
    col = lax.broadcasted_iota(jnp.int32, (G, T, T), 2)
    s = jnp.where(col <= row, s, jnp.float32(-1e30))              # finite mask value

    s = s - jnp.max(s, axis=-1, keepdims=True)
    p = jnp.exp(s)
    inv = pl.reciprocal(jnp.sum(p, axis=-1, keepdims=True), approx=True)  # EUP slot
    p = p * inv
    # (dropout on `p` is identity in eval mode)

    o_g = jnp.einsum('gts,gsd->gtd', p, v_g,
                     preferred_element_type=jnp.float32)          # (G, T, Dh)

    # Output projection with the head-concat folded in: contract each head's
    # (Dh) output against its slice of the proj weight and sum over heads.
    o_h = o_g.reshape(H, BT, Dh)                    # rows stay (b, t) ordered
    y = jnp.einsum('hnd,hdo->hno', o_h, wph_ref[...],
                   preferred_element_type=jnp.float32)            # (H, BT, C)
    y = jnp.sum(y, axis=0) + b_ref[...]                           # (BT, C)

    o_ref[...] = y.astype(o_ref.dtype)


@jax.jit
def multi_head_attention(x, wq, wk, wv, w_proj, b_proj):
    """x: (B,T,C); wq/wk/wv: (H,C,Dh); w_proj: (C,C) torch (out,in); b_proj: (C,)."""
    B, T, C = x.shape
    H, _, Dh = wq.shape
    BT = B * T
    scale = C ** (-0.5)       # module scales by n_embd (=C), not head_size

    # Fused QKV weight (C, 3C): head-major columns within each q/k/v group,
    # attention scale folded into the Q columns (trace-time, free).
    stack = lambda w: w.transpose(1, 0, 2).reshape(C, H * Dh)
    w_qkv = jnp.concatenate([stack(wq) * scale, stack(wk), stack(wv)], axis=1)

    # torch Linear computes y = x @ W.T + b; pre-transpose to (in, out) and
    # split the input rows per head so the kernel folds the head-concat into
    # the projection contraction.
    wph = w_proj.T.reshape(H, Dh, C)                  # (H, Dh, C)
    b2 = b_proj.reshape(1, C)

    x2 = x.reshape(BT, C)                             # contiguous: layout no-op

    kernel = functools.partial(_mha_kernel, batch=B, seq_len=T, num_heads=H)

    out = pl.pallas_call(
        kernel,
        out_shape=jax.ShapeDtypeStruct((BT, C), x.dtype),
        grid_spec=pltpu.PrefetchScalarGridSpec(
            num_scalar_prefetch=0,
            grid=(1,),                                # single step: whole problem resident in VMEM
            in_specs=[
                pl.BlockSpec((BT, C), lambda i: (0, 0)),         # x (all batch rows)
                pl.BlockSpec((C, 3 * C), lambda i: (0, 0)),      # fused QKV weight
                pl.BlockSpec((H, Dh, C), lambda i: (0, 0, 0)),   # per-head proj weight
                pl.BlockSpec((1, C), lambda i: (0, 0)),          # proj bias
            ],
            out_specs=pl.BlockSpec((BT, C), lambda i: (0, 0)),
        ),
        compiler_params=pltpu.CompilerParams(dimension_semantics=("arbitrary",)),
    )(x2, w_qkv, wph, b2)

    return out.reshape(B, T, C)


def _reference(x, wq, wk, wv, w_proj, b_proj):
    """Pure-JAX reference mirroring the PyTorch forward (eval mode)."""
    B, T, C = x.shape
    q = jnp.einsum("btc,hcd->bhtd", x, wq)
    k = jnp.einsum("btc,hcd->bhtd", x, wk)
    v = jnp.einsum("btc,hcd->bhtd", x, wv)
    s = jnp.einsum("bhtd,bhsd->bhts", q, k) * C ** (-0.5)
    mask = jnp.tril(jnp.ones((T, T), dtype=bool))
    s = jnp.where(mask[None, None], s, -jnp.inf)
    p = jax.nn.softmax(s, axis=-1)
    oh = jnp.einsum("bhts,bhsd->bhtd", p, v)                 # (B, H, T, Dh)
    concat = oh.transpose(0, 2, 1, 3).reshape(B, T, -1)      # (B, T, C)
    return concat @ w_proj.T + b_proj


if __name__ == "__main__":
    # Config consistent with the module: n_embd=32, n_head=4, head_size=8,
    # block_size=T=8, batch=2, dropout=0.0.
    B, T, C, H = 2, 8, 32, 4
    Dh = C // H

    key = jax.random.PRNGKey(0)
    kx, kq, kk, kv, kp, kb = jax.random.split(key, 6)

    x = jax.random.normal(kx, (B, T, C), dtype=jnp.float32)
    wq = 0.02 * jax.random.normal(kq, (H, C, Dh), dtype=jnp.float32)
    wk = 0.02 * jax.random.normal(kk, (H, C, Dh), dtype=jnp.float32)
    wv = 0.02 * jax.random.normal(kv, (H, C, Dh), dtype=jnp.float32)
    w_proj = 0.02 * jax.random.normal(kp, (C, C), dtype=jnp.float32)  # torch (out, in)
    b_proj = 0.01 * jax.random.normal(kb, (C,), dtype=jnp.float32)

    out = multi_head_attention(x, wq, wk, wv, w_proj, b_proj)
    out = jax.block_until_ready(out)

    ref = _reference(x, wq, wk, wv, w_proj, b_proj)
    # Tolerance accounts for the approximate EUP reciprocal in the softmax;
    # structural errors (wrong mask / head mixing) would be O(1) relative.
    np.testing.assert_allclose(np.asarray(out), np.asarray(ref), rtol=5e-3, atol=5e-4)

    print("KERNEL_OK")
</pallas_src>

<mosaic_0001>
module attributes {stable_mosaic.version = 11 : i64} {
  func.func @_mha_kernel(%arg0: i32, %arg1: memref<16x32xf32, #tpu.memory_space<vmem>>, %arg2: memref<32x96xf32, #tpu.memory_space<vmem>>, %arg3: memref<4x8x32xf32, #tpu.memory_space<vmem>>, %arg4: memref<1x32xf32, #tpu.memory_space<vmem>>, %arg5: memref<16x32xf32, #tpu.memory_space<vmem>>) attributes {dimension_semantics = [#tpu.dimension_semantics<arbitrary>], iteration_bounds = array<i64: 1>, scalar_prefetch = 0 : i64, scratch_operands = 0 : i64, tpu.core_type = #tpu.core_type<tc>, window_params = [{pipeline_mode = #tpu.pipeline_mode<synchronous>, transform_indices = @transform_0, window_bounds = array<i64: 16, 32>}, {pipeline_mode = #tpu.pipeline_mode<synchronous>, transform_indices = @transform_1, window_bounds = array<i64: 32, 96>}, {pipeline_mode = #tpu.pipeline_mode<synchronous>, transform_indices = @transform_2, window_bounds = array<i64: 4, 8, 32>}, {pipeline_mode = #tpu.pipeline_mode<synchronous>, transform_indices = @transform_3, window_bounds = array<i64: 1, 32>}, {pipeline_mode = #tpu.pipeline_mode<synchronous>, transform_indices = @transform_4, window_bounds = array<i64: 16, 32>}]} {
    %c0 = arith.constant 0 : index
    %c0_0 = arith.constant 0 : index
    %0 = vector.load %arg1[%c0, %c0_0] : memref<16x32xf32, #tpu.memory_space<vmem>>, vector<16x32xf32>
    %c0_1 = arith.constant 0 : index
    %c0_2 = arith.constant 0 : index
    %1 = vector.load %arg2[%c0_1, %c0_2] : memref<32x96xf32, #tpu.memory_space<vmem>>, vector<32x96xf32>
    %cst = arith.constant dense<0.000000e+00> : vector<16x96xf32>
    %2 = tpu.matmul %0, %1, %cst {dimension_numbers = #tpu.dot_dimension_numbers<[1], [0], [0], [1], [0, 0, 1, 1], [], []>} : vector<16x32xf32>, vector<32x96xf32>, vector<16x96xf32> -> vector<16x96xf32>
    %3 = vector.extract_strided_slice %2 {offsets = [0, 0], sizes = [16, 8], strides = [1, 1]} : vector<16x96xf32> to vector<16x8xf32>
    %4 = vector.extract_strided_slice %2 {offsets = [0, 8], sizes = [16, 8], strides = [1, 1]} : vector<16x96xf32> to vector<16x8xf32>
    %5 = vector.extract_strided_slice %2 {offsets = [0, 16], sizes = [16, 8], strides = [1, 1]} : vector<16x96xf32> to vector<16x8xf32>
    %6 = vector.extract_strided_slice %2 {offsets = [0, 24], sizes = [16, 8], strides = [1, 1]} : vector<16x96xf32> to vector<16x8xf32>
    %7 = tpu.concatenate %3, %4, %5, %6 in 0 : vector<16x8xf32>, vector<16x8xf32>, vector<16x8xf32>, vector<16x8xf32> -> vector<64x8xf32>
    %8 = vector.shape_cast %7 : vector<64x8xf32> to vector<8x8x8xf32>
    %9 = vector.extract_strided_slice %2 {offsets = [0, 32], sizes = [16, 8], strides = [1, 1]} : vector<16x96xf32> to vector<16x8xf32>
    %10 = vector.extract_strided_slice %2 {offsets = [0, 40], sizes = [16, 8], strides = [1, 1]} : vector<16x96xf32> to vector<16x8xf32>
    %11 = vector.extract_strided_slice %2 {offsets = [0, 48], sizes = [16, 8], strides = [1, 1]} : vector<16x96xf32> to vector<16x8xf32>
    %12 = vector.extract_strided_slice %2 {offsets = [0, 56], sizes = [16, 8], strides = [1, 1]} : vector<16x96xf32> to vector<16x8xf32>
    %13 = tpu.concatenate %9, %10, %11, %12 in 0 : vector<16x8xf32>, vector<16x8xf32>, vector<16x8xf32>, vector<16x8xf32> -> vector<64x8xf32>
    %14 = vector.shape_cast %13 : vector<64x8xf32> to vector<8x8x8xf32>
    %15 = vector.extract_strided_slice %2 {offsets = [0, 64], sizes = [16, 8], strides = [1, 1]} : vector<16x96xf32> to vector<16x8xf32>
    %16 = vector.extract_strided_slice %2 {offsets = [0, 72], sizes = [16, 8], strides = [1, 1]} : vector<16x96xf32> to vector<16x8xf32>
    %17 = vector.extract_strided_slice %2 {offsets = [0, 80], sizes = [16, 8], strides = [1, 1]} : vector<16x96xf32> to vector<16x8xf32>
    %18 = vector.extract_strided_slice %2 {offsets = [0, 88], sizes = [16, 8], strides = [1, 1]} : vector<16x96xf32> to vector<16x8xf32>
    %19 = tpu.concatenate %15, %16, %17, %18 in 0 : vector<16x8xf32>, vector<16x8xf32>, vector<16x8xf32>, vector<16x8xf32> -> vector<64x8xf32>
    %20 = vector.shape_cast %19 : vector<64x8xf32> to vector<8x8x8xf32>
    "tpu.trace_start"() <{level = 10 : i32, message = "gtd,gsd->gts"}> : () -> ()
    %cst_3 = arith.constant dense<0.000000e+00> : vector<8x8x8xf32>
    %21 = tpu.matmul %8, %14, %cst_3 {dimension_numbers = #tpu.dot_dimension_numbers<[2], [2], [1], [1], [0, 0, 0, 1, 1, 1], [0], [0]>} : vector<8x8x8xf32>, vector<8x8x8xf32>, vector<8x8x8xf32> -> vector<8x8x8xf32>
    "tpu.trace_stop"() : () -> ()
    %22 = tpu.iota {dimensions = array<i32: 1>} : vector<8x8x8xi32>
    %23 = tpu.iota {dimensions = array<i32: 2>} : vector<8x8x8xi32>
    %24 = arith.cmpi sle, %23, %22 : vector<8x8x8xi32>
    %cst_4 = arith.constant -1.000000e+30 : f32
    %25 = vector.broadcast %cst_4 : f32 to vector<8x8x8xf32>
    %26 = arith.select %24, %21, %25 : vector<8x8x8xi1>, vector<8x8x8xf32>
    %cst_5 = arith.constant dense<0xFF800000> : vector<8x8xf32>
    %27 = vector.multi_reduction <maximumf>, %26, %cst_5 [2] : vector<8x8x8xf32> to vector<8x8xf32>
    %28 = vector.shape_cast %27 : vector<8x8xf32> to vector<8x8x1xf32>
    %29 = vector.broadcast %28 : vector<8x8x1xf32> to vector<8x8x8xf32>
    %30 = arith.subf %26, %29 : vector<8x8x8xf32>
    %31 = math.exp %30 : vector<8x8x8xf32>
    %cst_6 = arith.constant dense<0.000000e+00> : vector<8x8xf32>
    %32 = vector.multi_reduction <add>, %31, %cst_6 [2] : vector<8x8x8xf32> to vector<8x8xf32>
    %33 = vector.shape_cast %32 : vector<8x8xf32> to vector<8x8x1xf32>
    %34 = tpu.reciprocal %33 {approx = true} : vector<8x8x1xf32> -> vector<8x8x1xf32>
    %35 = vector.broadcast %34 : vector<8x8x1xf32> to vector<8x8x8xf32>
    %36 = arith.mulf %31, %35 : vector<8x8x8xf32>
    "tpu.trace_start"() <{level = 10 : i32, message = "gts,gsd->gtd"}> : () -> ()
    %cst_7 = arith.constant dense<0.000000e+00> : vector<8x8x8xf32>
    %37 = tpu.matmul %36, %20, %cst_7 {dimension_numbers = #tpu.dot_dimension_numbers<[2], [1], [1], [2], [0, 0, 0, 1, 1, 2], [0], [0]>} : vector<8x8x8xf32>, vector<8x8x8xf32>, vector<8x8x8xf32> -> vector<8x8x8xf32>
    "tpu.trace_stop"() : () -> ()
    %38 = vector.shape_cast %37 : vector<8x8x8xf32> to vector<4x16x8xf32>
    %c0_8 = arith.constant 0 : index
    %c0_9 = arith.constant 0 : index
    %c0_10 = arith.constant 0 : index
    %39 = vector.load %arg3[%c0_8, %c0_9, %c0_10] : memref<4x8x32xf32, #tpu.memory_space<vmem>>, vector<4x8x32xf32>
    "tpu.trace_start"() <{level = 10 : i32, message = "hnd,hdo->hno"}> : () -> ()
    %cst_11 = arith.constant dense<0.000000e+00> : vector<4x16x32xf32>
    %40 = tpu.matmul %38, %39, %cst_11 {dimension_numbers = #tpu.dot_dimension_numbers<[2], [1], [1], [2], [0, 0, 0, 1, 1, 2], [0], [0]>} : vector<4x16x8xf32>, vector<4x8x32xf32>, vector<4x16x32xf32> -> vector<4x16x32xf32>
    "tpu.trace_stop"() : () -> ()
    %cst_12 = arith.constant dense<0.000000e+00> : vector<16x32xf32>
    %41 = vector.multi_reduction <add>, %40, %cst_12 [0] : vector<4x16x32xf32> to vector<16x32xf32>
    %c0_13 = arith.constant 0 : index
    %c0_14 = arith.constant 0 : index
    %42 = vector.load %arg4[%c0_13, %c0_14] : memref<1x32xf32, #tpu.memory_space<vmem>>, vector<1x32xf32>
    %43 = vector.broadcast %42 : vector<1x32xf32> to vector<16x32xf32>
    %44 = arith.addf %41, %43 : vector<16x32xf32>
    %c0_15 = arith.constant 0 : index
    %c0_16 = arith.constant 0 : index
    %45 = vector.load %arg5[%c0_15, %c0_16] : memref<16x32xf32, #tpu.memory_space<vmem>>, vector<16x32xf32>
    tpu.vector_store %arg5[%c0_15, %c0_16], %44 {strides = array<i32>} : memref<16x32xf32, #tpu.memory_space<vmem>>, vector<16x32xf32>,
    return
  }
  func.func @transform_0(%arg0: i32) -> (i32, i32) {
    %c0_i32 = arith.constant 0 : i32
    %c0_i32_0 = arith.constant 0 : i32
    %c0_i32_1 = arith.constant 0 : i32
    return %c0_i32, %c0_i32_0 : i32, i32
  }
  func.func @transform_1(%arg0: i32) -> (i32, i32) {
    %c0_i32 = arith.constant 0 : i32
    %c0_i32_0 = arith.constant 0 : i32
    %c0_i32_1 = arith.constant 0 : i32
    return %c0_i32, %c0_i32_0 : i32, i32
  }
  func.func @transform_2(%arg0: i32) -> (i32, i32, i32) {
    %c0_i32 = arith.constant 0 : i32
    %c0_i32_0 = arith.constant 0 : i32
    %c0_i32_1 = arith.constant 0 : i32
    %c0_i32_2 = arith.constant 0 : i32
    return %c0_i32, %c0_i32_0, %c0_i32_1 : i32, i32, i32
  }
  func.func @transform_3(%arg0: i32) -> (i32, i32) {
    %c0_i32 = arith.constant 0 : i32
    %c0_i32_0 = arith.constant 0 : i32
    %c0_i32_1 = arith.constant 0 : i32
    return %c0_i32, %c0_i32_0 : i32, i32
  }
  func.func @transform_4(%arg0: i32) -> (i32, i32) {
    %c0_i32 = arith.constant 0 : i32
    %c0_i32_0 = arith.constant 0 : i32
    %c0_i32_1 = arith.constant 0 : i32
    return %c0_i32, %c0_i32_0 : i32, i32
  }
}

</mosaic_0001>

<bundles_post_ra>
// kernel: multi_head_attention.1
= control target key start
LH: loop header
LB: loop body
LE: loop exit
PB: predicated region body
PF: predicated region fallthrough
CT: control target
= control target key end

     0   :  { %vm24_vm0 = vcmask 261120   ;;  %s2351_s0 = inlined_call_operand.vmem [shape: f32[16,32], index: 0, kind: input, shape index: {}]   ;;  %s2352_s1 = inlined_call_operand.vmem [shape: f32[32,96], index: 1, kind: input, shape index: {}]   ;;  %s2353_s2 = inlined_call_operand.vmem [shape: f32[4,8,32], index: 2, kind: input, shape index: {}]   ;;  %s2354_s3 = inlined_call_operand.vmem [shape: f32[1,32], index: 3, kind: input, shape index: {}]   ;;  %s2355_s4 = inlined_call_operand.hbm [shape: f32[16,32], index: 4, kind: output, shape index: {}]  }
   0x1   :  { %v20_v0 = vld [vmem:[%s2352_s1] sm:$0xff]  ;;  %v21_v1 = vld [vmem:[%s2352_s1 + $0x8] sm:$0xff]  ;;  %v22_v2 = vld [vmem:[%s2352_s1 + $0x10] sm:$0xff] }
   0x2   :  { %v2003_v3 = vpack.c.bf16 %v21_v1, %v20_v0  ;;  %v23_v4 = vld [vmem:[%s2352_s1 + $0x18] sm:$0xff]  ;;  %v18_v5 = vld [vmem:[%s2351_s0] sm:$0xff] }
   0x3   :  { %v2007_v6 = vpack.c.bf16 %v23_v4, %v22_v2  ;;  %1900 = vmatprep.mubr.msk.f32.mxu0 %vm24_vm0, %v18_v5 }
   0x4   :  { %9 = vsyncpa [#allocation3], 0  ;;  %2004 = vmatprep.subr.bf16.mxu0 %v2003_v3  ;;  %v19_v7 = vld [vmem:[%s2351_s0 + $0x8] sm:$0xff]  ;;  %v2077_v8 = vmov 0.0   ;;  %s2078_s1 = smov 112   ;;  %s2079_s27 = smov 120   ;;  %v729_v25 = vlaneseq }
   0x5   :  { %2006 = vmatpush3.bf16.msra.mxu0 %v2003_v3  ;;  %1903 = vmatprep.subr.mxu1 %v2077_v8  ;;  %vm2080_vm1 = vmmov 0   ;;  %s2081_s0 = smov 104   ;;  %s2082_s28 = smov 96   ;;  %vm122_vm2 = vcmask 64512  }
   0x6   :  { %2008 = vmatprep.subr.bf16.mxu0 %v2007_v6  ;;  %1905 = vmatprep.mubr.msk.f32.mxu1 %vm2080_vm1, %v2077_v8  ;;  %v730_v26 = vshrl.u32 %v729_v25, 7  ;;  %v732_v27 = vand.u32 127, %v729_v25  ;;  %s2083_s29 = smov 64   ;;  %s2084_s13 = smov [#allocation2]  }
   0x7   :  { %s1796_s14 = sshll.u32 %s2084_s13, 4  ;;  %s1797_s14 = int_to_ptr.vmem [resolvable:$true] %s1796_s14 }
   0x8   :  { %vm2216_vm3 = vcmp.le.s32.totalorder %v732_v27, %v730_v26  ;;  %s2053_s15 = scalar_lea.vmem %s1797_s14, 256  ;;  %p2058_p1 = scmp.lt.s32.totalorder %s1797_s14, %s1797_s14 }
   0x9   :  { %2010 = vmatpush3.bf16.msra.mxu0 %v2007_v6  ;;  %p2054_p0 = scmp.ne.s32.totalorder %s1797_s14, %s2053_s15  ;;  %p2059_p2 = scmp.lt.s32.totalorder %s2053_s15, %s2053_s15 }
   0xa   :  { %1913 = vmatprep.subr.mxu0 %v2077_v8 }
   0xb   :  { %p2060_p3 = por %p2059_p2, %p2058_p1 }
   0xc   :  { %1901 = vmatmul.mubr.msk.f32.vlgmr.msra.gmra.mrb[0].mxu0 %vm24_vm0, %v19_v7 }
   0xd   :  { %1915 = vmatprep.mubr.msk.f32.mxu0 %vm2080_vm1, %v2077_v8  ;;  %p2061_p4 = pnand %p2060_p3, %p2054_p0 }
  0xdf   :  { %v2134_v9 = vpop.f32.mrb[0].mxu0 }
  0xe0   :  { %v2136_v10 = vpop.f32.mrb[1].mxu0 }
  0xe1   :  { %112 = vrot.lane.b32.xlu1 %v2136_v10, %s2078_s1  ;;  %108 = vrot.lane.b32.xlu0 %v2136_v10, %s2079_s27 }
  0xe5   :  { %114 = vrot.lane.b32.xlu1 %v2134_v9, %s2078_s1  ;;  %110 = vrot.lane.b32.xlu0 %v2134_v9, %s2079_s27 }
  0xe9   :  { %118 = vrot.lane.b32.xlu1 %v2134_v9, %s2081_s0  ;;  %116 = vrot.lane.b32.xlu0 %v2136_v10, %s2081_s0 }
  0xed   :  { %197 = vrot.lane.b32.xlu1 %v2134_v9, %s2082_s28  ;;  %120 = vrot.lane.b32.xlu0 %v2136_v10, %s2082_s28 }
 0x153   :  { %v2150_v11 = vpop.permute.xlu1 %112  ;;  %v2152_v12 = vpop.permute.xlu0 %108 }
 0x154   :  { %273 = vrot.lane.b32.xlu0 %v2152_v12, %s2082_s28 }
 0x157   :  { %v2155_v13 = vpop.permute.xlu1 %114  ;;  %v2157_v14 = vpop.permute.xlu0 %110 }
 0x158   :  { %425 = vrot.lane.b32.xlu0 %v2150_v11, %s2082_s28  ;;  %349 = vrot.lane.b32.xlu1 %v2157_v14, %s2082_s28 }
 0x15b   :  { %v2161_v15 = vpop.permute.xlu0 %116  ;;  %v2165_v16 = vpop.permute.xlu1 %118 }
 0x15c   :  { %501 = vrot.lane.b32.xlu1 %v2155_v13, %s2082_s28  ;;  %577 = vrot.lane.b32.xlu0 %v2161_v15, %s2082_s28 }
 0x15f   :  { %v121_v17 = vpop.permute.xlu0 %120  ;;  %v198_v18 = vpop.permute.xlu1 %197 }
 0x160   :  { %653 = vrot.lane.b32.xlu1 %v2165_v16, %s2082_s28  ;;  %1904 = vmatpush3.xpose.msk.msra.mxu1 %vm122_vm2, %v121_v17 }
 0x161   :  { %1908 = vmatprep.subr.mxu1 %v2077_v8 }
 0x163   :  { %1906 = vmatmul.mubr.msk.f32.vlgmr.msra.gmra.mrb[0].mxu1 %vm122_vm2, %v2136_v10 }
 0x164   :  { %1909 = vmatpush3.xpose.msk.msra.mxu1 %vm122_vm2, %v198_v18  ;;  %1910 = vmatprep.mubr.msk.f32.mxu1 %vm2080_vm1, %v2077_v8 }
 0x165   :  { %1918 = vmatprep.subr.mxu1 %v2077_v8 }
 0x167   :  { %1911 = vmatmul.mubr.msk.f32.vlgmr.msra.gmra.mrb[2].mxu1 %vm122_vm2, %v2134_v9 }
 0x168   :  { %1920 = vmatprep.mubr.msk.f32.mxu1 %vm2080_vm1, %v2077_v8 }
 0x1c6   :  { %v274_v19 = vpop.permute.xlu0 %273 }
 0x1c7   :  { %1914 = vmatpush3.xpose.msk.msra.mxu0 %vm122_vm2, %v274_v19 }
 0x1c8   :  { %1923 = vmatprep.subr.mxu0 %v2077_v8 }
 0x1ca   :  { %v350_v20 = vpop.permute.xlu1 %349  ;;  %1916 = vmatmul.mubr.msk.f32.vlgmr.msra.gmra.mrb[2].mxu0 %vm122_vm2, %v2152_v12  ;;  %v426_v21 = vpop.permute.xlu0 %425 }
 0x1cb   :  { %1919 = vmatpush3.xpose.msk.msra.mxu1 %vm122_vm2, %v350_v20  ;;  %1924 = vmatpush3.xpose.msk.msra.mxu0 %vm122_vm2, %v426_v21 }
 0x1cc   :  { %1925 = vmatprep.mubr.msk.f32.mxu0 %vm2080_vm1, %v2077_v8  ;;  %1928 = vmatprep.subr.mxu1 %v2077_v8 }
 0x1cd   :  { %1933 = vmatprep.subr.mxu0 %v2077_v8 }
 0x1ce   :  { %v502_v22 = vpop.permute.xlu1 %501  ;;  %1921 = vmatmul.mubr.msk.f32.vlgmr.msra.gmra.mrb[4].mxu1 %vm122_vm2, %v2157_v14  ;;  %1926 = vmatmul.mubr.msk.f32.vlgmr.msra.gmra.mrb[4].mxu0 %vm122_vm2, %v2150_v11  ;;  %v578_v23 = vpop.permute.xlu0 %577 }
 0x1cf   :  { %1929 = vmatpush3.xpose.msk.msra.mxu1 %vm122_vm2, %v502_v22  ;;  %1934 = vmatpush3.xpose.msk.msra.mxu0 %vm122_vm2, %v578_v23 }
 0x1d0   :  { %1930 = vmatprep.mubr.msk.f32.mxu1 %vm2080_vm1, %v2077_v8  ;;  %1935 = vmatprep.mubr.msk.f32.mxu0 %vm2080_vm1, %v2077_v8 }
 0x1d1   :  { %1938 = vmatprep.subr.mxu1 %v2077_v8  ;;  %1943 = vmatprep.subr.mxu0 %v2077_v8 }
 0x1d2   :  { %v654_v24 = vpop.permute.xlu1 %653  ;;  %1931 = vmatmul.mubr.msk.f32.vlgmr.msra.gmra.mrb[6].mxu1 %vm122_vm2, %v2155_v13  ;;  %1936 = vmatmul.mubr.msk.f32.vlgmr.msra.gmra.mrb[6].mxu0 %vm122_vm2, %v2161_v15 }
 0x1d3   :  { %1939 = vmatpush3.xpose.msk.msra.mxu1 %vm122_vm2, %v654_v24  ;;  %1940 = vmatprep.mubr.msk.f32.mxu1 %vm2080_vm1, %v2077_v8 }
 0x1d4   :  { %1948 = vmatprep.subr.mxu1 %v2077_v8  ;;  %1945 = vmatprep.mubr.msk.f32.mxu0 %vm2080_vm1, %v2077_v8 }
 0x1d6   :  { %1941 = vmatmul.mubr.msk.f32.vlgmr.msra.gmra.mrb[8].mxu1 %vm122_vm2, %v2165_v16 }
 0x1d7   :  { %1950 = vmatprep.mubr.msk.f32.mxu1 %vm2080_vm1, %v2077_v8 }
 0x236   :  { %v193_v29 = vpop.f32.mrb[0].mxu1 }
 0x237   :  { %v734_v30 = vsel %vm2216_vm3, %v193_v29, -1e+30  ;;  %v1907_v31 = vpop.f32.mrb[1].mxu1 }
 0x238   :  { %v742_v32 = vsel %vm122_vm2, %v734_v30, -inf }
 0x239   :  { %743 = vmax.xlane.f32.xlu0 %v742_v32 }
 0x23a   :  { %v269_v33 = vpop.f32.mrb[2].mxu1 }
 0x23b   :  { %v735_v34 = vsel %vm2216_vm3, %v269_v33, -1e+30  ;;  %v1912_v35 = vpop.f32.mrb[3].mxu1 }
 0x23c   :  { %v745_v36 = vsel %vm122_vm2, %v735_v34, -inf }
 0x23d   :  { %746 = vmax.xlane.f32.xlu1 %v745_v36 }
 0x29d   :  { %v345_v37 = vpop.f32.mrb[2].mxu0 }
 0x29e   :  { %v736_v38 = vsel %vm2216_vm3, %v345_v37, -1e+30  ;;  %v1917_v39 = vpop.f32.mrb[3].mxu0 }
 0x29f   :  { %v748_v40 = vsel %vm122_vm2, %v736_v38, -inf }
 0x2a0   :  { %749 = vmax.xlane.f32.xlu0 %v748_v40 }
 0x2a1   :  { %v421_v41 = vpop.f32.mrb[4].mxu1  ;;  %v497_v42 = vpop.f32.mrb[4].mxu0 }
 0x2a2   :  { %v737_v43 = vsel %vm2216_vm3, %v421_v41, -1e+30  ;;  %v738_v44 = vsel %vm2216_vm3, %v497_v42, -1e+30  ;;  %v1922_v45 = vpop.f32.mrb[5].mxu1  ;;  %v1927_v46 = vpop.f32.mrb[5].mxu0 }
 0x2a3   :  { %v751_v47 = vsel %vm122_vm2, %v737_v43, -inf  ;;  %v754_v48 = vsel %vm122_vm2, %v738_v44, -inf }
 0x2a4   :  { %752 = vmax.xlane.f32.xlu0 %v751_v47  ;;  %755 = vmax.xlane.f32.xlu1 %v754_v48 }
 0x2a5   :  { %v573_v49 = vpop.f32.mrb[6].mxu1  ;;  %v649_v50 = vpop.f32.mrb[6].mxu0 }
 0x2a6   :  { %v739_v51 = vsel %vm2216_vm3, %v573_v49, -1e+30  ;;  %v740_v52 = vsel %vm2216_vm3, %v649_v50, -1e+30  ;;  %v1932_v53 = vpop.f32.mrb[7].mxu1  ;;  %v1937_v54 = vpop.f32.mrb[7].mxu0 }
 0x2a7   :  { %v757_v55 = vsel %vm122_vm2, %v739_v51, -inf  ;;  %v760_v56 = vsel %vm122_vm2, %v740_v52, -inf }
 0x2a8   :  { %758 = vmax.xlane.f32.xlu0 %v757_v55  ;;  %761 = vmax.xlane.f32.xlu1 %v760_v56 }
 0x2a9   :  { %v725_v57 = vpop.f32.mrb[8].mxu1 }
 0x2aa   :  { %v741_v58 = vsel %vm2216_vm3, %v725_v57, -1e+30  ;;  %v1942_v59 = vpop.f32.mrb[9].mxu1 }
 0x2ab   :  { %v763_v60 = vsel %vm122_vm2, %v741_v58, -inf }
 0x2ac   :  { %764 = vmax.xlane.f32.xlu0 %v763_v60 }
 0x2b9   :  { %830 = vrot.lane.b32.xlu1 %v2136_v10, %s2083_s29 }
 0x2bd   :  { %982 = vrot.lane.b32.xlu1 %v2152_v12, %s2083_s29 }
 0x2c1   :  { %1058 = vrot.lane.b32.xlu1 %v2157_v14, %s2083_s29 }
 0x2c2   :  { %906 = vrot.lane.b32.xlu0 %v2134_v9, %s2083_s29 }
 0x2c5   :  { %1210 = vrot.lane.b32.xlu1 %v2155_v13, %s2083_s29 }
 0x2c6   :  { %1134 = vrot.lane.b32.xlu0 %v2150_v11, %s2083_s29  ;;  %v744_v63 = vpop.xlane.xlu0 %743 }
 0x2c7   :  { %v766_v0 = vsub.f32 %v734_v30, %v744_v63 }
 0x2c9   :  { %v774_v2 = vmul.f32 1.442695, %v766_v0  ;;  %v1438_v0 = vld [vmem:[%s2353_s2] sm:$0xff] }
 0x2ca   :  { %v747_v61 = vpop.xlane.xlu1 %746 }
 0x2cb   :  { %v767_v62 = vsub.f32 %v735_v34, %v747_v61 }
 0x2cd   :  { %v776_v1 = vmul.f32 1.442695, %v767_v62 }
 0x2cf   :  { %2021 = vpow2.f32 %v776_v1 }
 0x2d0   :  { %2023 = vpow2.f32 %v774_v2 }
 0x2d9   :  { %v2256_v3 = vpop.eup %2021 }
 0x2da   :  { %v793_v4 = vsel %vm122_vm2, %v2256_v3, 0.0  ;;  %v2260_v5 = vpop.eup %2023 }
 0x2db   :  { %v790_v6 = vsel %vm122_vm2, %v2260_v5, 0.0 }
 0x2e5   :  { %794 = vadd.xlane.f32.xlu0 %v793_v4 }
 0x2e9   :  { %791 = vadd.xlane.f32.xlu1 %v790_v6 }
 0x32d   :  { %v750_v7 = vpop.xlane.xlu0 %749 }
 0x32e   :  { %v768_v9 = vsub.f32 %v736_v38, %v750_v7  ;;  %v1439_v7 = vld [vmem:[%s2353_s2 + $0x8] sm:$0xff] }
 0x330   :  { %v778_v10 = vmul.f32 1.442695, %v768_v9  ;;  %v1440_v9 = vld [vmem:[%s2353_s2 + $0x10] sm:$0xff] }
 0x331   :  { %v756_v11 = vpop.xlane.xlu1 %755  ;;  %v753_v12 = vpop.xlane.xlu0 %752 }
 0x332   :  { %2025 = vpow2.f32 %v778_v10  ;;  %v770_v13 = vsub.f32 %v738_v44, %v756_v11  ;;  %v769_v14 = vsub.f32 %v737_v43, %v753_v12  ;;  %v1441_v10 = vld [vmem:[%s2353_s2 + $0x18] sm:$0xff] }
 0x334   :  { %v782_v17 = vmul.f32 1.442695, %v770_v13  ;;  %v780_v18 = vmul.f32 1.442695, %v769_v14 }
 0x335   :  { %v762_v19 = vpop.xlane.xlu1 %761  ;;  %v759_v20 = vpop.xlane.xlu0 %758 }
 0x336   :  { %2027 = vpow2.f32 %v782_v17  ;;  %v772_v21 = vsub.f32 %v740_v52, %v762_v19  ;;  %v771_v22 = vsub.f32 %v739_v51, %v759_v20 }
 0x337   :  { %2029 = vpow2.f32 %v780_v18 }
 0x338   :  { %v786_v23 = vmul.f32 1.442695, %v772_v21  ;;  %v784_v24 = vmul.f32 1.442695, %v771_v22 }
 0x339   :  { %v831_v25 = vpop.permute.xlu1 %830  ;;  %v765_v26 = vpop.xlane.xlu0 %764 }
 0x33a   :  { %2031 = vpow2.f32 %v786_v23  ;;  %v773_v27 = vsub.f32 %v741_v58, %v765_v26  ;;  %1944 = vmatpush3.msra.mxu0 %v831_v25 }
 0x33b   :  { %2033 = vpow2.f32 %v784_v24  ;;  %1953 = vmatprep.subr.mxu0 %v2077_v8 }
 0x33c   :  { %v2026_v28 = vpop.eup %2025  ;;  %v788_v29 = vmul.f32 1.442695, %v773_v27 }
 0x33d   :  { %v907_v30 = vpop.permute.xlu0 %906  ;;  %v796_v31 = vsel %vm122_vm2, %v2026_v28, 0.0  ;;  %v983_v42 = vpop.permute.xlu1 %982 }
 0x33e   :  { %2035 = vpow2.f32 %v788_v29  ;;  %797 = vadd.xlane.f32.xlu1 %v796_v31  ;;  %1949 = vmatpush3.msra.mxu1 %v907_v30 }
 0x33f   :  { %1958 = vmatprep.subr.mxu1 %v2077_v8 }
 0x340   :  { %v2028_v32 = vpop.eup %2027 }
 0x341   :  { %v2030_v33 = vpop.eup %2029  ;;  %v802_v34 = vsel %vm122_vm2, %v2028_v32, 0.0  ;;  %v1059_v43 = vpop.permute.xlu1 %1058 }
 0x342   :  { %803 = vadd.xlane.f32.xlu1 %v802_v34  ;;  %v799_v35 = vsel %vm122_vm2, %v2030_v33, 0.0  ;;  %v1135_v44 = vpop.permute.xlu0 %1134 }
 0x343   :  { %800 = vadd.xlane.f32.xlu0 %v799_v35 }
 0x344   :  { %v2032_v36 = vpop.eup %2031 }
 0x345   :  { %v2034_v37 = vpop.eup %2033  ;;  %v808_v38 = vsel %vm122_vm2, %v2032_v36, 0.0  ;;  %v1211_v45 = vpop.permute.xlu1 %1210 }
 0x346   :  { %809 = vadd.xlane.f32.xlu1 %v808_v38  ;;  %v805_v39 = vsel %vm122_vm2, %v2034_v37, 0.0 }
 0x347   :  { %806 = vadd.xlane.f32.xlu0 %v805_v39 }
 0x348   :  { %v2271_v40 = vpop.eup %2035 }
 0x349   :  { %v811_v41 = vsel %vm122_vm2, %v2271_v40, 0.0 }
 0x34b   :  { %812 = vadd.xlane.f32.xlu0 %v811_v41 }
 0x357   :  { %1362 = vrot.lane.b32.xlu1 %v2165_v16, %s2083_s29 }
 0x361   :  { %1286 = vrot.lane.b32.xlu0 %v2161_v15, %s2083_s29 }
 0x372   :  { %v795_v46 = vpop.xlane.xlu0 %794 }
 0x373   :  { %2037 = vrcp.f32 %v795_v46  ;;  %v1841_v46 = vld [vmem:[%s2354_s3] ss:$0 sm:$0xff] }
 0x376   :  { %v792_v47 = vpop.xlane.xlu1 %791 }
 0x377   :  { %2039 = vrcp.f32 %v792_v47 }
 0x37d   :  { %v2038_v48 = vpop.eup %2037 }
 0x37e   :  { %v823_v49 = vmul.f32 %v2038_v48, %v2256_v3 }
 0x380   :  { %1951 = vmatmul.mubr.msk.f32.vlgmr.msra.gmra.mrb[10].mxu1 %vm122_vm2, %v823_v49 }
 0x381   :  { %v2040_v50 = vpop.eup %2039  ;;  %1959 = vmatpush3.msra.mxu1 %v1059_v43  ;;  %1960 = vmatprep.mubr.msk.f32.mxu1 %vm2080_vm1, %v2077_v8 }
 0x382   :  { %v822_v15 = vmul.f32 %v2040_v50, %v2260_v5  ;;  %1968 = vmatprep.subr.mxu1 %v2077_v8 }
 0x384   :  { %1946 = vmatmul.mubr.msk.f32.vlgmr.msra.gmra.mrb[8].mxu0 %vm122_vm2, %v822_v15 }
 0x385   :  { %1954 = vmatpush3.msra.mxu0 %v983_v42  ;;  %1955 = vmatprep.mubr.msk.f32.mxu0 %vm2080_vm1, %v2077_v8 }
 0x386   :  { %1963 = vmatprep.subr.mxu0 %v2077_v8 }
 0x3cb   :  { %v798_v16 = vpop.xlane.xlu1 %797 }
 0x3cc   :  { %2041 = vrcp.f32 %v798_v16 }
 0x3cf   :  { %v804_v51 = vpop.xlane.xlu1 %803 }
 0x3d0   :  { %2043 = vrcp.f32 %v804_v51  ;;  %v801_v52 = vpop.xlane.xlu0 %800 }
 0x3d1   :  { %2045 = vrcp.f32 %v801_v52 }
 0x3d3   :  { %v810_v53 = vpop.xlane.xlu1 %809 }
 0x3d4   :  { %2047 = vrcp.f32 %v810_v53  ;;  %v807_v54 = vpop.xlane.xlu0 %806 }
 0x3d5   :  { %2049 = vrcp.f32 %v807_v54 }
 0x3d6   :  { %v2042_v55 = vpop.eup %2041 }
 0x3d7   :  { %v824_v56 = vmul.f32 %v2042_v55, %v2026_v28  ;;  %v1363_v4 = vpop.permute.xlu1 %1362 }
 0x3d8   :  { %v813_v57 = vpop.xlane.xlu0 %812 }
 0x3d9   :  { %2051 = vrcp.f32 %v813_v57  ;;  %1956 = vmatmul.mubr.msk.f32.vlgmr.msra.gmra.mrb[10].mxu0 %vm122_vm2, %v824_v56 }
 0x3da   :  { %v2044_v58 = vpop.eup %2043  ;;  %1964 = vmatpush3.msra.mxu0 %v1135_v44  ;;  %1965 = vmatprep.mubr.msk.f32.mxu0 %vm2080_vm1, %v2077_v8 }
 0x3db   :  { %v2046_v59 = vpop.eup %2045  ;;  %v826_v60 = vmul.f32 %v2044_v58, %v2028_v32  ;;  %1973 = vmatprep.subr.mxu0 %v2077_v8 }
 0x3dc   :  { %v825_v61 = vmul.f32 %v2046_v59, %v2030_v33  ;;  %v1287_v62 = vpop.permute.xlu0 %1286 }
 0x3dd   :  { %1966 = vmatmul.mubr.msk.f32.vlgmr.msra.gmra.mrb[12].mxu0 %vm122_vm2, %v826_v60 }
 0x3de   :  { %v2048_v63 = vpop.eup %2047  ;;  %1961 = vmatmul.mubr.msk.f32.vlgmr.msra.gmra.mrb[12].mxu1 %vm122_vm2, %v825_v61  ;;  %1974 = vmatpush3.msra.mxu0 %v1287_v62 }
 0x3df   :  { %v2050_v1 = vpop.eup %2049  ;;  %v828_v2 = vmul.f32 %v2048_v63, %v2032_v36  ;;  %1969 = vmatpush3.msra.mxu1 %v1211_v45  ;;  %1970 = vmatprep.mubr.msk.f32.mxu1 %vm2080_vm1, %v2077_v8 }
 0x3e0   :  { %v827_v3 = vmul.f32 %v2050_v1, %v2034_v37  ;;  %1975 = vmatprep.mubr.msk.f32.mxu0 %vm2080_vm1, %v2077_v8  ;;  %1978 = vmatprep.subr.mxu1 %v2077_v8 }
 0x3e1   :  { %1976 = vmatmul.mubr.msk.f32.vlgmr.msra.gmra.mrb[14].mxu0 %vm122_vm2, %v828_v2  ;;  %1983 = vmatprep.subr.mxu0 %v1438_v0 }
 0x3e2   :  { %1971 = vmatmul.mubr.msk.f32.vlgmr.msra.gmra.mrb[14].mxu1 %vm122_vm2, %v827_v3  ;;  %1984 = vmatpush3.msra.mxu0 %v1438_v0 }
 0x3e3   :  { %v2052_v5 = vpop.eup %2051  ;;  %1979 = vmatpush3.msra.mxu1 %v1363_v4  ;;  %1980 = vmatprep.mubr.msk.f32.mxu1 %vm2080_vm1, %v2077_v8 }
 0x3e4   :  { %v829_v6 = vmul.f32 %v2052_v5, %v2271_v40  ;;  %1988 = vmatprep.subr.mxu1 %v1439_v7  ;;  %1993 = vmatprep.subr.mxu0 %v1440_v9 }
 0x3e6   :  { %1981 = vmatmul.mubr.msk.f32.vlgmr.msra.gmra.mrb[16].mxu1 %vm122_vm2, %v829_v6 }
 0x3e7   :  { %1989 = vmatpush3.msra.mxu1 %v1439_v7 }
 0x3e8   :  { %1998 = vmatprep.subr.mxu1 %v1441_v10 }
 0x453   :  { %v978_v8 = vpop.f32.mrb[10].mxu1 }
 0x454   :  { %v1952_v11 = vpop.f32.mrb[11].mxu1 }
 0x457   :  { %v902_v12 = vpop.f32.mrb[8].mxu0 }
 0x458   :  { %v1947_v13 = vpop.f32.mrb[9].mxu0  ;;  %1985 = vmatprep.mubr.msk.f32.mxu0 %vm122_vm2, %v902_v12 }
 0x459   :  { %1986 = vmatmul.mubr.msk.f32.vlgmr.msra.gmra.mrb[16].mxu0 %vm122_vm2, %v978_v8 }
 0x45a   :  { %1994 = vmatpush3.msra.mxu0 %v1440_v9 }
 0x4ac   :  { %v1054_v14 = vpop.f32.mrb[10].mxu0 }
 0x4ad   :  { %v1957_v17 = vpop.f32.mrb[11].mxu0  ;;  %1990 = vmatprep.mubr.msk.f32.mxu1 %vm122_vm2, %v1054_v14 }
 0x4b0   :  { %v1206_v18 = vpop.f32.mrb[12].mxu0 }
 0x4b1   :  { %v1130_v19 = vpop.f32.mrb[12].mxu1  ;;  %v1967_v20 = vpop.f32.mrb[13].mxu0  ;;  %1995 = vmatprep.mubr.msk.f32.mxu0 %vm122_vm2, %v1206_v18 }
 0x4b2   :  { %v1962_v21 = vpop.f32.mrb[13].mxu1  ;;  %1991 = vmatmul.mubr.msk.f32.vlgmr.msra.gmra.mrb[18].mxu1 %vm122_vm2, %v1130_v19 }
 0x4b3   :  { %1999 = vmatpush3.msra.mxu1 %v1441_v10 }
 0x4b4   :  { %v1358_v22 = vpop.f32.mrb[14].mxu0 }
 0x4b5   :  { %v1282_v23 = vpop.f32.mrb[14].mxu1  ;;  %v1977_v24 = vpop.f32.mrb[15].mxu0  ;;  %2000 = vmatprep.mubr.msk.f32.mxu1 %vm122_vm2, %v1358_v22 }
 0x4b6   :  { %v1972_v25 = vpop.f32.mrb[15].mxu1  ;;  %1996 = vmatmul.mubr.msk.f32.vlgmr.msra.gmra.mrb[18].mxu0 %vm122_vm2, %v1282_v23 }
 0x4b9   :  { %v1434_v26 = vpop.f32.mrb[16].mxu1 }
 0x4ba   :  { %v1982_v27 = vpop.f32.mrb[17].mxu1  ;;  %2001 = vmatmul.mubr.msk.f32.vlgmr.msra.gmra.mrb[20].mxu1 %vm122_vm2, %v1434_v26 }
 0x52c   :  { %v1987_v28 = vpop.f32.mrb[16].mxu0 }
 0x52d   :  { %v1514_v29 = vpop.f32.mrb[17].mxu0  ;;  %v1773_v31 = vsel %vm24_vm0, %v1987_v28, 0.0 }
 0x52e   :  { %v1766_v34 = vsel %vm24_vm0, %v1514_v29, 0.0 }
 0x585   :  { %v1992_v30 = vpop.f32.mrb[18].mxu1 }
 0x586   :  { %v1774_v32 = vsel %vm24_vm0, %v1992_v30, 0.0  ;;  %v1595_v33 = vpop.f32.mrb[19].mxu1 }
 0x587   :  { %v1775_v35 = vadd.f32 %v1774_v32, %v1773_v31  ;;  %v1767_v36 = vsel %vm24_vm0, %v1595_v33, 0.0 }
 0x588   :  { %v1768_v37 = vadd.f32 %v1767_v36, %v1766_v34 }
 0x589   :  { %v1997_v38 = vpop.f32.mrb[18].mxu0 }
 0x58a   :  { %v1776_v39 = vsel %vm24_vm0, %v1997_v38, 0.0  ;;  %v1676_v40 = vpop.f32.mrb[19].mxu0 }
 0x58b   :  { %v1777_v41 = vadd.f32 %v1776_v39, %v1775_v35  ;;  %v1769_v42 = vsel %vm24_vm0, %v1676_v40, 0.0 }
 0x58c   :  { %v1770_v43 = vadd.f32 %v1769_v42, %v1768_v37 }
 0x58d   :  { %v2002_v44 = vpop.f32.mrb[20].mxu1 }
 0x58e   :  { %v1778_v45 = vsel %vm24_vm0, %v2002_v44, 0.0  ;;  %v1757_v47 = vpop.f32.mrb[21].mxu1 }
 0x58f   :  { %v1779_v48 = vadd.f32 %v1778_v45, %v1777_v41  ;;  %v1771_v49 = vsel %vm24_vm0, %v1757_v47, 0.0 }
 0x590   :  { %v1772_v50 = vadd.f32 %v1771_v49, %v1770_v43 }
 0x591   :  { %v1788_v15 = vadd.f32 %v1841_v46, %v1779_v48 }
 0x592   :  { %v1787_v16 = vadd.f32 %v1841_v46, %v1772_v50 }
 0x593   :  { %1790 = vst.msk [vmem:[#allocation2 + $0x8] sm:$0xff] %vm24_vm0, %v1788_v15 }
 0x594   :  { %1789 = vst.msk [vmem:[#allocation2] sm:$0xff] %vm24_vm0, %v1787_v16 }
 0x595   :  { %2064 = shalt.err (!%p2061_p4)
}
 0x596   :  { %s2065_s17 = scalar_lea.hbm %s2355_s4, 256 }
 0x597   :  { %p2066_p5 = scmp.ne.s32.totalorder %s2355_s4, %s2065_s17  ;;  %p2069_p6 = scmp.lt.u32.totalorder %s2065_s17, %s2355_s4 }
 0x599   :  { %p2071_p7 = pnand %p2069_p6, %p2066_p5 }
 0x59b   :  { %2074 = shalt.err (!%p2071_p7)
}
 0x59c   :  { %s2085_s22 = smov 128   ;;  %s2086_s23 = smov 8  }
 0x59d   :  { %1802 = dma.vmem_to_hbm [thread:$0]  %s1797_s14, 256, %s2355_s4, [#allocation3], %s2085_s22, %s2085_s22, %s2086_s23  }
 0x59e   :  { %2075 = dma.done.wait [#allocation3], 256  }
 0x59f   :  { %2076 = vsyncadd [#allocation3], 4294967040 }
 0x5a0   :  { %1806 = vsyncpa [#allocation3], 1 }

</bundles_post_ra>
